<compile_context>
chip_gen: v7x
topology: tpu7x:2x2x1
jax: 0.10.0
libtpu: 0.0.40
codegen_flags: <defaults>
</compile_context>

<pallas_src>
import jax
import jax.numpy as jnp
from jax import lax
from jax.experimental import pallas as pl
from jax.experimental.pallas import tpu as pltpu


def _round_up(x, m):
    return (x + m - 1) // m * m


def vum_kernel(scale_ref, x_ref, w_ref, b_ref, o_ref, acc_ref):
    """One (tm, tn) output tile, accumulated over the K grid axis.

    scale_ref : SMEM (1,) f32      -- weight_norm(dim=None) scalar g / ||v||_F
    x_ref     : VMEM (tm, tk)      -- input tile
    w_ref     : VMEM (tn, tk)      -- raw 'v' tile, native (out_dim, in_dim) layout
    b_ref     : VMEM (1, tn)       -- bias tile
    o_ref     : VMEM (tm, tn)      -- output tile
    acc_ref   : VMEM (tm, tn) f32  -- accumulator scratch (persists across K steps)
    """
    k = pl.program_id(2)

    @pl.when(k == 0)
    def _():
        acc_ref[...] = jnp.zeros_like(acc_ref)

    # MXU: contract x (tm, tk) with v (tn, tk) along their last dims -> (tm, tn).
    acc_ref[...] += lax.dot_general(
        x_ref[...], w_ref[...],
        dimension_numbers=(((1,), (1,)), ((), ())),
        preferred_element_type=jnp.float32)

    # Epilogue only on the final K step: weight-norm scale, bias, ReLU, cast.
    @pl.when(k == pl.num_programs(2) - 1)
    def _():
        y = acc_ref[...] * scale_ref[0] + b_ref[...].astype(jnp.float32)
        y = jnp.maximum(y, 0.0)
        # Dropout (eval mode) == identity.
        o_ref[...] = y.astype(o_ref.dtype)


def vum_layer(x, v, g, b, *, tm=256, tn=256, tk=512, compute_dtype=None):
    """VUMLayer forward (eval mode): ReLU(x @ (g * v / ||v||_F).T + b).

    x: [B, in_dim]; v: [out_dim, in_dim] (weight_norm 'v'); g: scalar 'g'; b: [out_dim].
    compute_dtype: optionally cast x/v (e.g. jnp.bfloat16 on v6e/v7x); accumulation stays f32.
    """
    B, in_dim = x.shape
    out_dim = v.shape[0]
    out_dtype = x.dtype

    # weight_norm(dim=None): w = g * v / ||v||_F  ->  fold into one scalar (f32).
    scale = (g.astype(jnp.float32)
             / jnp.sqrt(jnp.sum(v.astype(jnp.float32) ** 2))).reshape((1,))

    if compute_dtype is not None:
        x = x.astype(compute_dtype)
        v = v.astype(compute_dtype)

    # Effective tile sizes: respect (8, 128) layout, don't over-tile tiny dims.
    tm = min(tm, _round_up(B, 8))
    tn = min(tn, _round_up(out_dim, 128))   # lane-dense output tiles (>=128)
    tk = min(tk, _round_up(in_dim, 128))

    Mp = _round_up(B, tm)
    Np = _round_up(out_dim, tn)
    Kp = _round_up(in_dim, tk)

    # Zero-padding: extra K columns contribute 0 to the dot product; extra
    # N rows of v / bias produce zeros that are sliced off below.
    x_p = jnp.pad(x, ((0, Mp - B), (0, Kp - in_dim)))
    v_p = jnp.pad(v, ((0, Np - out_dim), (0, Kp - in_dim)))          # no transpose
    b_p = jnp.pad(b, (0, Np - out_dim)).reshape(1, Np).astype(jnp.float32)

    grid = (Mp // tm, Np // tn, Kp // tk)

    bytes_accessed = (x_p.size * x_p.dtype.itemsize
                      + v_p.size * v_p.dtype.itemsize
                      + b_p.size * 4
                      + Mp * Np * jnp.dtype(out_dtype).itemsize)
    cost = pl.CostEstimate(flops=2 * Mp * Np * Kp,
                           transcendentals=0,
                           bytes_accessed=bytes_accessed)

    out_p = pl.pallas_call(
        vum_kernel,
        out_shape=jax.ShapeDtypeStruct((Mp, Np), out_dtype),
        grid=grid,
        in_specs=[
            pl.BlockSpec(memory_space=pltpu.MemorySpace.SMEM),      # scale (1,) scalar
            pl.BlockSpec((tm, tk), lambda i, j, k: (i, k)),         # x tile
            pl.BlockSpec((tn, tk), lambda i, j, k: (j, k)),         # v tile (out, in)
            pl.BlockSpec((1, tn), lambda i, j, k: (0, j)),          # bias tile
        ],
        out_specs=pl.BlockSpec((tm, tn), lambda i, j, k: (i, j)),
        scratch_shapes=[pltpu.VMEM((tm, tn), jnp.float32)],
        compiler_params=pltpu.CompilerParams(
            dimension_semantics=("parallel", "parallel", "arbitrary")),
        cost_estimate=cost,
    )(scale, x_p, v_p, b_p)

    return out_p[:B, :out_dim]


if __name__ == "__main__":
    key = jax.random.PRNGKey(0)
    k_x, k_v, k_g, k_b = jax.random.split(key, 4)

    B, in_dim, out_dim = 8, 32, 32
    x = jax.random.normal(k_x, (B, in_dim), dtype=jnp.float32)
    v = jax.random.normal(k_v, (out_dim, in_dim), dtype=jnp.float32) * 0.1
    g = jax.random.normal(k_g, (), dtype=jnp.float32) + 1.0   # weight_norm 'g' (scalar, dim=None)
    b = jax.random.normal(k_b, (out_dim,), dtype=jnp.float32) * 0.1

    out = vum_layer(x, v, g, b)
    out = jax.block_until_ready(out)

    # reference (plain JAX) check of forward semantics
    w_ref = g * v / jnp.sqrt(jnp.sum(v ** 2))
    ref = jnp.maximum(x @ w_ref.T + b, 0.0)
    assert out.shape == (B, out_dim)
    assert jnp.allclose(out, ref, atol=1e-5, rtol=1e-5)

    print("KERNEL_OK")
</pallas_src>

<mosaic_0001>
module attributes {stable_mosaic.version = 11 : i64} {
  func.func @vum_kernel(%arg0: i32, %arg1: i32, %arg2: i32, %arg3: memref<1xf32, #tpu.memory_space<smem>>, %arg4: memref<8x128xf32, #tpu.memory_space<vmem>>, %arg5: memref<128x128xf32, #tpu.memory_space<vmem>>, %arg6: memref<1x128xf32, #tpu.memory_space<vmem>>, %arg7: memref<8x128xf32, #tpu.memory_space<vmem>>, %arg8: memref<8x128xf32, #tpu.memory_space<vmem>>) attributes {dimension_semantics = [#tpu.dimension_semantics<parallel>, #tpu.dimension_semantics<parallel>, #tpu.dimension_semantics<arbitrary>], iteration_bounds = array<i64: 1, 1, 1>, scalar_prefetch = 0 : i64, scratch_operands = 1 : i64, tpu.core_type = #tpu.core_type<tc>, window_params = [{transform_indices = @transform_0, window_bounds = array<i64: 1>}, {transform_indices = @transform_1, window_bounds = array<i64: 8, 128>}, {transform_indices = @transform_2, window_bounds = array<i64: 128, 128>}, {transform_indices = @transform_3, window_bounds = array<i64: 1, 128>}, {transform_indices = @transform_4, window_bounds = array<i64: 8, 128>}]} {
    %c0_i32 = arith.constant 0 : i32
    %0 = arith.cmpi eq, %arg2, %c0_i32 : i32
    %1 = arith.extui %0 : i1 to i32
    %c0_i32_0 = arith.constant 0 : i32
    %2 = arith.cmpi ne, %1, %c0_i32_0 : i32
    scf.if %2 {
      %cst_10 = arith.constant 0.000000e+00 : f32
      %12 = vector.broadcast %cst_10 : f32 to vector<8x128xf32>
      %c0_11 = arith.constant 0 : index
      %c0_12 = arith.constant 0 : index
      %13 = vector.load %arg8[%c0_11, %c0_12] : memref<8x128xf32, #tpu.memory_space<vmem>>, vector<8x128xf32>
      tpu.vector_store %arg8[%c0_11, %c0_12], %12 {strides = array<i32>} : memref<8x128xf32, #tpu.memory_space<vmem>>, vector<8x128xf32>,
    } else {
    }
    %c0 = arith.constant 0 : index
    %c0_1 = arith.constant 0 : index
    %3 = vector.load %arg8[%c0, %c0_1] : memref<8x128xf32, #tpu.memory_space<vmem>>, vector<8x128xf32>
    %c0_2 = arith.constant 0 : index
    %c0_3 = arith.constant 0 : index
    %4 = vector.load %arg4[%c0_2, %c0_3] : memref<8x128xf32, #tpu.memory_space<vmem>>, vector<8x128xf32>
    %c0_4 = arith.constant 0 : index
    %c0_5 = arith.constant 0 : index
    %5 = vector.load %arg5[%c0_4, %c0_5] : memref<128x128xf32, #tpu.memory_space<vmem>>, vector<128x128xf32>
    %cst = arith.constant dense<0.000000e+00> : vector<8x128xf32>
    %6 = tpu.matmul %4, %5, %cst {dimension_numbers = #tpu.dot_dimension_numbers<[1], [1], [0], [0], [0, 0, 1, 0], [], []>} : vector<8x128xf32>, vector<128x128xf32>, vector<8x128xf32> -> vector<8x128xf32>
    %7 = arith.addf %3, %6 : vector<8x128xf32>
    %c0_6 = arith.constant 0 : index
    %c0_7 = arith.constant 0 : index
    %8 = vector.load %arg8[%c0_6, %c0_7] : memref<8x128xf32, #tpu.memory_space<vmem>>, vector<8x128xf32>
    tpu.vector_store %arg8[%c0_6, %c0_7], %7 {strides = array<i32>} : memref<8x128xf32, #tpu.memory_space<vmem>>, vector<8x128xf32>,
    %c0_i32_8 = arith.constant 0 : i32
    %9 = arith.cmpi eq, %arg2, %c0_i32_8 : i32
    %10 = arith.extui %9 : i1 to i32
    %c0_i32_9 = arith.constant 0 : i32
    %11 = arith.cmpi ne, %10, %c0_i32_9 : i32
    scf.if %11 {
      %c0_10 = arith.constant 0 : index
      %c0_11 = arith.constant 0 : index
      %12 = vector.load %arg8[%c0_10, %c0_11] : memref<8x128xf32, #tpu.memory_space<vmem>>, vector<8x128xf32>
      %c0_12 = arith.constant 0 : index
      %13 = memref.load %arg3[%c0_12] : memref<1xf32, #tpu.memory_space<smem>>
      %14 = vector.broadcast %13 : f32 to vector<8x128xf32>
      %15 = arith.mulf %12, %14 : vector<8x128xf32>
      %c0_13 = arith.constant 0 : index
      %c0_14 = arith.constant 0 : index
      %16 = vector.load %arg6[%c0_13, %c0_14] : memref<1x128xf32, #tpu.memory_space<vmem>>, vector<1x128xf32>
      %17 = vector.broadcast %16 : vector<1x128xf32> to vector<8x128xf32>
      %18 = arith.addf %15, %17 : vector<8x128xf32>
      %cst_15 = arith.constant 0.000000e+00 : f32
      %19 = vector.broadcast %cst_15 : f32 to vector<8x128xf32>
      %20 = arith.maximumf %18, %19 : vector<8x128xf32>
      %c0_16 = arith.constant 0 : index
      %c0_17 = arith.constant 0 : index
      %21 = vector.load %arg7[%c0_16, %c0_17] : memref<8x128xf32, #tpu.memory_space<vmem>>, vector<8x128xf32>
      tpu.vector_store %arg7[%c0_16, %c0_17], %20 {strides = array<i32>} : memref<8x128xf32, #tpu.memory_space<vmem>>, vector<8x128xf32>,
    } else {
    }
    return
  }
  func.func @transform_0(%arg0: i32, %arg1: i32, %arg2: i32) -> i32 {
    %c0_i32 = arith.constant 0 : i32
    %c0_i32_0 = arith.constant 0 : i32
    return %c0_i32 : i32
  }
  func.func @transform_1(%arg0: i32, %arg1: i32, %arg2: i32) -> (i32, i32) {
    %c0_i32 = arith.constant 0 : i32
    return %arg0, %arg2 : i32, i32
  }
  func.func @transform_2(%arg0: i32, %arg1: i32, %arg2: i32) -> (i32, i32) {
    %c0_i32 = arith.constant 0 : i32
    return %arg1, %arg2 : i32, i32
  }
  func.func @transform_3(%arg0: i32, %arg1: i32, %arg2: i32) -> (i32, i32) {
    %c0_i32 = arith.constant 0 : i32
    %c0_i32_0 = arith.constant 0 : i32
    return %c0_i32, %arg1 : i32, i32
  }
  func.func @transform_4(%arg0: i32, %arg1: i32, %arg2: i32) -> (i32, i32) {
    %c0_i32 = arith.constant 0 : i32
    return %arg0, %arg1 : i32, i32
  }
}

</mosaic_0001>

<bundles_post_ra>
// kernel: tpu_custom_call.1
= control target key start
LH: loop header
LB: loop body
LE: loop exit
PB: predicated region body
PF: predicated region fallthrough
CT: control target
= control target key end

     0   :  { %10 = vsyncpa [#allocation5], 0  ;;  %s412_s0 = inlined_call_operand.<no memory space> [shape: f32[1], index: 0, kind: input, shape index: {}]   ;;  %s413_s1 = inlined_call_operand.hbm [shape: f32[8,128], index: 1, kind: input, shape index: {}]   ;;  %s414_s2 = inlined_call_operand.hbm [shape: f32[128,128], index: 2, kind: input, shape index: {}]   ;;  %s415_s3 = inlined_call_operand.vmem [shape: f32[1,128], index: 3, kind: input, shape index: {}]   ;;  %s416_s4 = inlined_call_operand.hbm [shape: f32[8,128], index: 4, kind: output, shape index: {}]  }
   0x1   :  { %11 = vsyncpa [#allocation8], 0 }
   0x2   :  { %12 = vsyncpa [#allocation6], 0  ;;  %s330_s15 = smov [#allocation4]   ;;  %s331_s17 = smov [#allocation7]  }
   0x3   :  { %s21_s16 = sshll.u32 %s330_s15, 4  ;;  %s30_s18 = sshll.u32 %s331_s17, 4  ;;  %s22_s16 = int_to_ptr.vmem [resolvable:$true] %s21_s16  ;;  %s363_s18 = int_to_ptr.vmem [resolvable:$true] %s30_s18 }
   0x4   :  { %s258_s21 = scalar_lea.hbm %s413_s1, 128 }
   0x5   :  { %p259_p0 = scmp.ne.s32.totalorder %s413_s1, %s258_s21  ;;  %p262_p1 = scmp.lt.u32.totalorder %s258_s21, %s413_s1 }
   0x7   :  { %p264_p2 = pnand %p262_p1, %p259_p0 }
   0x9   :  { %267 = shalt.err (!%p264_p2)
}
   0xa   :  { %s268_s26 = scalar_lea.vmem %s22_s16, 128  ;;  %p273_p4 = scmp.lt.s32.totalorder %s22_s16, %s22_s16 }
   0xb   :  { %p269_p3 = scmp.ne.s32.totalorder %s22_s16, %s268_s26  ;;  %p274_p5 = scmp.lt.s32.totalorder %s268_s26, %s268_s26 }
   0xd   :  { %p275_p6 = por %p274_p5, %p273_p4 }
   0xf   :  { %p276_p7 = pnand %p275_p6, %p269_p3 }
  0x11   :  { %279 = shalt.err (!%p276_p7)
}
  0x12   :  { %24 = dma.hbm_to_vmem [thread:$0]  %s413_s1, 128, %s22_s16, [#allocation5]  }
  0x13   :  { %s280_s5 = scalar_lea.hbm %s414_s2, 2048 }
  0x14   :  { %p281_p8 = scmp.ne.s32.totalorder %s414_s2, %s280_s5  ;;  %p284_p9 = scmp.lt.u32.totalorder %s280_s5, %s414_s2 }
  0x16   :  { %p286_p10 = pnand %p284_p9, %p281_p8 }
  0x18   :  { %289 = shalt.err (!%p286_p10)
}
  0x19   :  { %s290_s10 = scalar_lea.vmem %s363_s18, 2048  ;;  %p295_p12 = scmp.lt.s32.totalorder %s363_s18, %s363_s18 }
  0x1a   :  { %p291_p11 = scmp.ne.s32.totalorder %s363_s18, %s290_s10  ;;  %p296_p13 = scmp.lt.s32.totalorder %s290_s10, %s290_s10 }
  0x1c   :  { %p297_p0 = por %p296_p13, %p295_p12 }
  0x1e   :  { %p298_p1 = pnand %p297_p0, %p291_p11 }
  0x20   :  { %301 = shalt.err (!%p298_p1)
}
  0x21   :  { %s332_s1 = smov 128   ;;  %s333_s11 = smov 8  }
  0x22   :  { %36 = dma.hbm_to_vmem [thread:$0]  %s414_s2, 2048, %s363_s18, [#allocation8], %s332_s1, %s332_s1, %s333_s11  }
  0x23   :  { %324 = dma.done.wait [#allocation5], 128  }
  0x24   :  { %325 = vsyncadd [#allocation5], 4294967168 }
  0x25   :  { %326 = dma.done.wait [#allocation8], 2048  }
  0x26   :  { %327 = vsyncadd [#allocation8], 4294965248  ;;  %v334_v0 = vmov 0.0|0.0   ;;  %vm335_vm0 = vmmov 0   ;;  %v336_v1 = vmov 0.0   ;;  %v52_v2 = vld [vmem:[#allocation7] sm:$0xff]  ;;  %v145_v27 = vstv %s412_s0 }
  0x27   :  { %226 = vmatprep.subr.bf16.mxu0 %v334_v0  ;;  %223 = vmatprep.mubr.msk.f32.mxu0 %vm335_vm0, %v336_v1  ;;  %v53_v3 = vld [vmem:[#allocation7 + $0x8] sm:$0xff]  ;;  %v54_v5 = vld [vmem:[#allocation7 + $0x10] sm:$0xff]  ;;  %v55_v6 = vld [vmem:[#allocation7 + $0x18] sm:$0xff]  ;;  %s337_s17 = smov [#allocation9]  }
  0x28   :  { %v227_v4 = vpack.c.bf16 %v53_v3, %v52_v2  ;;  %v230_v7 = vpack.c.bf16 %v55_v6, %v54_v5  ;;  %v56_v8 = vld [vmem:[#allocation7 + $0x20] sm:$0xff]  ;;  %v57_v9 = vld [vmem:[#allocation7 + $0x28] sm:$0xff]  ;;  %v58_v11 = vld [vmem:[#allocation7 + $0x30] sm:$0xff]  ;;  %s163_s18 = sshll.u32 %s337_s17, 4  ;;  %s164_s18 = int_to_ptr.vmem [resolvable:$true] %s163_s18 }
  0x29   :  { %v233_v10 = vpack.c.bf16 %v57_v9, %v56_v8  ;;  %v59_v12 = vld [vmem:[#allocation7 + $0x38] sm:$0xff]  ;;  %v60_v14 = vld [vmem:[#allocation7 + $0x40] sm:$0xff]  ;;  %v61_v15 = vld [vmem:[#allocation7 + $0x48] sm:$0xff]  ;;  %s302_s19 = scalar_lea.vmem %s164_s18, 128  ;;  %p307_p3 = scmp.lt.s32.totalorder %s164_s18, %s164_s18 }
  0x2a   :  { %228 = vmatpush3.bf16.xpose.msra.mxu0 %v227_v4  ;;  %v236_v13 = vpack.c.bf16 %v59_v12, %v58_v11  ;;  %v239_v16 = vpack.c.bf16 %v61_v15, %v60_v14  ;;  %v62_v17 = vld [vmem:[#allocation7 + $0x50] sm:$0xff]  ;;  %v63_v18 = vld [vmem:[#allocation7 + $0x58] sm:$0xff]  ;;  %v64_v20 = vld [vmem:[#allocation7 + $0x60] sm:$0xff]  ;;  %p303_p2 = scmp.ne.s32.totalorder %s164_s18, %s302_s19  ;;  %p308_p4 = scmp.lt.s32.totalorder %s302_s19, %s302_s19 }
  0x2b   :  { %229 = vmatprep.subr.bf16.mxu0 %v334_v0  ;;  %v242_v19 = vpack.c.bf16 %v63_v18, %v62_v17  ;;  %v65_v21 = vld [vmem:[#allocation7 + $0x68] sm:$0xff]  ;;  %v66_v23 = vld [vmem:[#allocation7 + $0x70] sm:$0xff]  ;;  %v67_v24 = vld [vmem:[#allocation7 + $0x78] sm:$0xff] }
  0x2c   :  { %v245_v22 = vpack.c.bf16 %v65_v21, %v64_v20  ;;  %v248_v25 = vpack.c.bf16 %v67_v24, %v66_v23  ;;  %v51_v26 = vld [vmem:[#allocation4] sm:$0xff]  ;;  %p309_p5 = por %p308_p4, %p307_p3 }
  0x2d   :  { %v173_v29 = vld [vmem:[%s415_s3] ss:$0 sm:$0xff] }
  0x2e   :  { %p310_p6 = pnand %p309_p5, %p303_p2 }
  0x32   :  { %231 = vmatpush3.bf16.xpose.msra.mxu0 %v230_v7 }
  0x33   :  { %232 = vmatprep.subr.bf16.mxu0 %v334_v0 }
  0x3a   :  { %234 = vmatpush3.bf16.xpose.msra.mxu0 %v233_v10 }
  0x3b   :  { %235 = vmatprep.subr.bf16.mxu0 %v334_v0 }
  0x42   :  { %237 = vmatpush3.bf16.xpose.msra.mxu0 %v236_v13 }
  0x43   :  { %238 = vmatprep.subr.bf16.mxu0 %v334_v0 }
  0x4a   :  { %240 = vmatpush3.bf16.xpose.msra.mxu0 %v239_v16 }
  0x4b   :  { %241 = vmatprep.subr.bf16.mxu0 %v334_v0 }
  0x52   :  { %243 = vmatpush3.bf16.xpose.msra.mxu0 %v242_v19 }
  0x53   :  { %244 = vmatprep.subr.bf16.mxu0 %v334_v0 }
  0x5a   :  { %246 = vmatpush3.bf16.xpose.msra.mxu0 %v245_v22 }
  0x5b   :  { %247 = vmatprep.subr.bf16.mxu0 %v334_v0 }
  0x62   :  { %249 = vmatpush3.bf16.xpose.msra.mxu0 %v248_v25 }
  0x69   :  { %224 = vmatmul.mubr.f32.vlgmr.msra.gmra.mrb[0].mxu0 %v51_v26 }
 0x13c   :  { %v134_v28 = vpop.f32.mrb[0].mxu0 }
 0x13d   :  { %v146_v30 = vmul.f32 %v145_v27, %v134_v28  ;;  %v225_v31 = vpop.f32.mrb[1].mxu0 }
 0x13f   :  { %v154_v32 = vadd.f32 %v173_v29, %v146_v30 }
 0x141   :  { %v155_v33 = vmax.f32 %v154_v32, 0.0 }
 0x143   :  { %156 = vst [vmem:[#allocation9] sm:$0xff] %v155_v33 }
 0x144   :  { %313 = shalt.err (!%p310_p6)
}
 0x145   :  { %s314_s21 = scalar_lea.hbm %s416_s4, 128 }
 0x146   :  { %p315_p7 = scmp.ne.s32.totalorder %s416_s4, %s314_s21  ;;  %p318_p8 = scmp.lt.u32.totalorder %s314_s21, %s416_s4 }
 0x148   :  { %p320_p9 = pnand %p318_p8, %p315_p7 }
 0x14a   :  { %323 = shalt.err (!%p320_p9)
}
 0x14b   :  { %166 = dma.vmem_to_hbm [thread:$0]  %s164_s18, 128, %s416_s4, [#allocation6]  }
 0x14c   :  { %328 = dma.done.wait [#allocation6], 128  }
 0x14d   :  { %329 = vsyncadd [#allocation6], 4294967168 }
 0x14e   :  { %170 = vsyncpa [#allocation5], 1 }
 0x14f   :  { %171 = vsyncpa [#allocation8], 1 }
 0x150   :  { %172 = vsyncpa [#allocation6], 1 }

</bundles_post_ra>
